<compile_context>
chip_gen: v7x
topology: tpu7x:2x2x1
jax: 0.10.0
libtpu: 0.0.40
codegen_flags: <defaults>
</compile_context>

<pallas_src>
import functools

import jax
import jax.numpy as jnp
from jax.experimental import pallas as pl
from jax.experimental.pallas import tpu as pltpu

_LANE = 128
_SUBLANE = 8
_NEG_BIG = -1e30  # "minus infinity" for padded logit columns (finite, f32-safe)


def _round_up(x, m):
    return ((x + m - 1) // m) * m


def _mlp_kernel(x_ref, w1_ref, b1_ref, w2_ref, b2_ref, w3_ref, b3_ref,
                o_ref, *, apply_softmax: bool):
    x = x_ref[...]

    # fc1 + ReLU (f32 accumulate, f32 elementwise)
    a1 = jnp.dot(x, w1_ref[...], preferred_element_type=jnp.float32) + b1_ref[...]
    a1 = jnp.maximum(a1, 0.0)

    # fc2 + ReLU (cast activation to the MXU input dtype of the weights)
    a1 = a1.astype(w2_ref.dtype)
    a2 = jnp.dot(a1, w2_ref[...], preferred_element_type=jnp.float32) + b2_ref[...]
    a2 = jnp.maximum(a2, 0.0)

    # fc3
    a2 = a2.astype(w3_ref.dtype)
    y = jnp.dot(a2, w3_ref[...], preferred_element_type=jnp.float32) + b3_ref[...]

    if apply_softmax:
        # Stable softmax over the (lane-dense, padded) class axis. Padded
        # columns carry a huge negative bias -> exp underflows to exactly 0.
        m = jnp.max(y, axis=-1, keepdims=True)
        e = jnp.exp(y - m)
        y = e * pl.reciprocal(jnp.sum(e, axis=-1, keepdims=True), approx=True)

    o_ref[...] = y.astype(o_ref.dtype)


def mlp_forward(x, params, apply_softmax=False, *, tile_b=512,
                mxu_dtype=jnp.float32):
    """Fused MLP forward.

    x: (B, input_size) f32. params: dict w1,b1,w2,b2,w3,b3 (w transposed vs.
    nn.Linear). mxu_dtype: dtype fed to the MXU for x and the weights
    (jnp.bfloat16 halves HBM traffic on v6e/v7x; accumulation stays f32).
    """
    w1, b1 = params["w1"], params["b1"]
    w2, b2 = params["w2"], params["b2"]
    w3, b3 = params["w3"], params["b3"]

    B, in_size = x.shape
    h1 = w1.shape[1]
    h2 = w2.shape[1]
    num_classes = w3.shape[1]

    # ---- lane-dense output: pad class dim to a multiple of 128 ----
    c_pad = _round_up(num_classes, _LANE)
    if c_pad != num_classes:
        w3 = jnp.pad(w3, ((0, 0), (0, c_pad - num_classes)))
        b3 = jnp.pad(b3, ((0, 0), (0, c_pad - num_classes)),
                     constant_values=_NEG_BIG)

    # ---- batch tiling: tile must be a multiple of 8 sublanes ----
    tb = min(int(tile_b), _round_up(B, _SUBLANE))
    tb = _round_up(tb, _SUBLANE)
    b_padded = _round_up(B, tb)
    if b_padded != B:
        x = jnp.pad(x, ((0, b_padded - B), (0, 0)))

    # ---- optional reduced-precision MXU inputs (biases stay f32) ----
    use_lowp = jnp.dtype(mxu_dtype) != jnp.dtype(jnp.float32)
    if use_lowp:
        x = x.astype(mxu_dtype)
        w1 = w1.astype(mxu_dtype)
        w2 = w2.astype(mxu_dtype)
        w3 = w3.astype(mxu_dtype)
    itemsize = jnp.dtype(mxu_dtype).itemsize if use_lowp else 4

    grid = (b_padded // tb,)
    kernel = functools.partial(_mlp_kernel, apply_softmax=apply_softmax)

    def resident(a):  # full-array block, same block every grid step -> stays in VMEM
        return pl.BlockSpec(a.shape, lambda i: (0, 0))

    # ---- VMEM budget (sized so it also fits v7x's 64 MiB physical VMEM) ----
    weight_bytes = (w1.size + w2.size + w3.size) * itemsize \
        + (b1.size + b2.size + b3.size) * 4
    stream_bytes = 2 * tb * (in_size * itemsize + c_pad * 4)   # 2x-buffered x/out
    interm_bytes = 2 * tb * (h1 + h2) * 4                       # a1/a2 headroom
    vmem_limit = int(weight_bytes + stream_bytes + interm_bytes + (4 << 20))
    vmem_limit = min(max(vmem_limit, 8 << 20), 48 << 20)

    # ---- cost hint for the surrounding XLA schedule ----
    flops = 2 * b_padded * (in_size * h1 + h1 * h2 + h2 * c_pad)
    transcendentals = b_padded * c_pad if apply_softmax else 0
    bytes_accessed = int(x.size * itemsize + weight_bytes + b_padded * c_pad * 4)
    cost = pl.CostEstimate(flops=flops, transcendentals=transcendentals,
                           bytes_accessed=bytes_accessed)

    out = pl.pallas_call(
        kernel,
        out_shape=jax.ShapeDtypeStruct((b_padded, c_pad), jnp.float32),
        grid=grid,
        in_specs=[
            pl.BlockSpec((tb, in_size), lambda i: (i, 0)),   # x: tiled over batch
            resident(w1), resident(b1),
            resident(w2), resident(b2),
            resident(w3), resident(b3),
        ],
        out_specs=pl.BlockSpec((tb, c_pad), lambda i: (i, 0)),
        compiler_params=pltpu.CompilerParams(
            dimension_semantics=("parallel",),
            vmem_limit_bytes=vmem_limit),
        cost_estimate=cost,
    )(x, w1, b1, w2, b2, w3, b3)

    # strip batch padding and the lane-padding on the class axis
    return out[:B, :num_classes]


def init_mlp_params(key, input_size, hidden_size, num_classes):
    """Deterministic init matching nn.Linear's default U(-1/sqrt(fan_in), +...)."""
    dims = [input_size, hidden_size[0], hidden_size[1], num_classes]
    params = {}
    for i in range(3):
        fan_in, fan_out = dims[i], dims[i + 1]
        key, kw, kb = jax.random.split(key, 3)
        bound = 1.0 / jnp.sqrt(jnp.float32(fan_in))
        params[f"w{i+1}"] = jax.random.uniform(
            kw, (fan_in, fan_out), jnp.float32, minval=-bound, maxval=bound)
        params[f"b{i+1}"] = jax.random.uniform(
            kb, (1, fan_out), jnp.float32, minval=-bound, maxval=bound)
    return params


def mlp_reference(x, params, apply_softmax=False):
    a1 = jax.nn.relu(x @ params["w1"] + params["b1"])
    a2 = jax.nn.relu(a1 @ params["w2"] + params["b2"])
    y = a2 @ params["w3"] + params["b3"]
    if apply_softmax:
        y = jax.nn.softmax(y, axis=1)
    return y


if __name__ == "__main__":
    key = jax.random.PRNGKey(0)
    key, kx = jax.random.split(key)

    batch = 8
    input_size = 32
    hidden_size = (64, 32)
    num_classes = 10

    x = jax.random.normal(kx, (batch, input_size), jnp.float32)
    params = init_mlp_params(key, input_size, hidden_size, num_classes)

    # logits path (f32 MXU inputs -> tight tolerance)
    y = mlp_forward(x, params, apply_softmax=False)
    y = jax.block_until_ready(y)
    y_ref = mlp_reference(x, params, apply_softmax=False)
    assert y.shape == (batch, num_classes)
    assert jnp.allclose(y, y_ref, atol=1e-5, rtol=1e-5), "logits mismatch"

    # softmax path (approx EUP reciprocal -> slightly relaxed tolerance)
    p = mlp_forward(x, params, apply_softmax=True)
    p = jax.block_until_ready(p)
    p_ref = mlp_reference(x, params, apply_softmax=True)
    assert jnp.allclose(p, p_ref, atol=1e-3, rtol=1e-3), "softmax mismatch"

    # bf16 MXU path (halves HBM traffic for x/weights on v6e/v7x; f32 accumulate)
    y16 = mlp_forward(x, params, apply_softmax=False, mxu_dtype=jnp.bfloat16)
    y16 = jax.block_until_ready(y16)
    assert jnp.allclose(y16, y_ref, atol=2e-2, rtol=2e-2), "bf16 logits mismatch"

    print("KERNEL_OK")
</pallas_src>

<mosaic_0001>
module attributes {stable_mosaic.version = 11 : i64} {
  func.func @_mlp_kernel(%arg0: i32, %arg1: memref<8x32xf32, #tpu.memory_space<vmem>>, %arg2: memref<32x64xf32, #tpu.memory_space<vmem>>, %arg3: memref<1x64xf32, #tpu.memory_space<vmem>>, %arg4: memref<64x32xf32, #tpu.memory_space<vmem>>, %arg5: memref<1x32xf32, #tpu.memory_space<vmem>>, %arg6: memref<32x128xf32, #tpu.memory_space<vmem>>, %arg7: memref<1x128xf32, #tpu.memory_space<vmem>>, %arg8: memref<8x128xf32, #tpu.memory_space<vmem>>) attributes {dimension_semantics = [#tpu.dimension_semantics<parallel>], iteration_bounds = array<i64: 1>, scalar_prefetch = 0 : i64, scratch_operands = 0 : i64, tpu.core_type = #tpu.core_type<tc>, window_params = [{transform_indices = @transform_0, window_bounds = array<i64: 8, 32>}, {pipeline_mode = #tpu.pipeline_mode<synchronous>, transform_indices = @transform_1, window_bounds = array<i64: 32, 64>}, {pipeline_mode = #tpu.pipeline_mode<synchronous>, transform_indices = @transform_2, window_bounds = array<i64: 1, 64>}, {pipeline_mode = #tpu.pipeline_mode<synchronous>, transform_indices = @transform_3, window_bounds = array<i64: 64, 32>}, {pipeline_mode = #tpu.pipeline_mode<synchronous>, transform_indices = @transform_4, window_bounds = array<i64: 1, 32>}, {pipeline_mode = #tpu.pipeline_mode<synchronous>, transform_indices = @transform_5, window_bounds = array<i64: 32, 128>}, {pipeline_mode = #tpu.pipeline_mode<synchronous>, transform_indices = @transform_6, window_bounds = array<i64: 1, 128>}, {transform_indices = @transform_7, window_bounds = array<i64: 8, 128>}]} {
    %c0 = arith.constant 0 : index
    %c0_0 = arith.constant 0 : index
    %0 = vector.load %arg1[%c0, %c0_0] : memref<8x32xf32, #tpu.memory_space<vmem>>, vector<8x32xf32>
    %c0_1 = arith.constant 0 : index
    %c0_2 = arith.constant 0 : index
    %1 = vector.load %arg2[%c0_1, %c0_2] : memref<32x64xf32, #tpu.memory_space<vmem>>, vector<32x64xf32>
    %cst = arith.constant dense<0.000000e+00> : vector<8x64xf32>
    %2 = tpu.matmul %0, %1, %cst {dimension_numbers = #tpu.dot_dimension_numbers<[1], [0], [0], [1], [0, 0, 1, 1], [], []>} : vector<8x32xf32>, vector<32x64xf32>, vector<8x64xf32> -> vector<8x64xf32>
    %c0_3 = arith.constant 0 : index
    %c0_4 = arith.constant 0 : index
    %3 = vector.load %arg3[%c0_3, %c0_4] : memref<1x64xf32, #tpu.memory_space<vmem>>, vector<1x64xf32>
    %4 = vector.broadcast %3 : vector<1x64xf32> to vector<8x64xf32>
    %5 = arith.addf %2, %4 : vector<8x64xf32>
    %cst_5 = arith.constant 0.000000e+00 : f32
    %6 = vector.broadcast %cst_5 : f32 to vector<8x64xf32>
    %7 = arith.maximumf %5, %6 : vector<8x64xf32>
    %c0_6 = arith.constant 0 : index
    %c0_7 = arith.constant 0 : index
    %8 = vector.load %arg4[%c0_6, %c0_7] : memref<64x32xf32, #tpu.memory_space<vmem>>, vector<64x32xf32>
    %cst_8 = arith.constant dense<0.000000e+00> : vector<8x32xf32>
    %9 = tpu.matmul %7, %8, %cst_8 {dimension_numbers = #tpu.dot_dimension_numbers<[1], [0], [0], [1], [0, 0, 1, 1], [], []>} : vector<8x64xf32>, vector<64x32xf32>, vector<8x32xf32> -> vector<8x32xf32>
    %c0_9 = arith.constant 0 : index
    %c0_10 = arith.constant 0 : index
    %10 = vector.load %arg5[%c0_9, %c0_10] : memref<1x32xf32, #tpu.memory_space<vmem>>, vector<1x32xf32>
    %11 = vector.broadcast %10 : vector<1x32xf32> to vector<8x32xf32>
    %12 = arith.addf %9, %11 : vector<8x32xf32>
    %cst_11 = arith.constant 0.000000e+00 : f32
    %13 = vector.broadcast %cst_11 : f32 to vector<8x32xf32>
    %14 = arith.maximumf %12, %13 : vector<8x32xf32>
    %c0_12 = arith.constant 0 : index
    %c0_13 = arith.constant 0 : index
    %15 = vector.load %arg6[%c0_12, %c0_13] : memref<32x128xf32, #tpu.memory_space<vmem>>, vector<32x128xf32>
    %cst_14 = arith.constant dense<0.000000e+00> : vector<8x128xf32>
    %16 = tpu.matmul %14, %15, %cst_14 {dimension_numbers = #tpu.dot_dimension_numbers<[1], [0], [0], [1], [0, 0, 1, 1], [], []>} : vector<8x32xf32>, vector<32x128xf32>, vector<8x128xf32> -> vector<8x128xf32>
    %c0_15 = arith.constant 0 : index
    %c0_16 = arith.constant 0 : index
    %17 = vector.load %arg7[%c0_15, %c0_16] : memref<1x128xf32, #tpu.memory_space<vmem>>, vector<1x128xf32>
    %18 = vector.broadcast %17 : vector<1x128xf32> to vector<8x128xf32>
    %19 = arith.addf %16, %18 : vector<8x128xf32>
    %c0_17 = arith.constant 0 : index
    %c0_18 = arith.constant 0 : index
    %20 = vector.load %arg8[%c0_17, %c0_18] : memref<8x128xf32, #tpu.memory_space<vmem>>, vector<8x128xf32>
    tpu.vector_store %arg8[%c0_17, %c0_18], %19 {strides = array<i32>} : memref<8x128xf32, #tpu.memory_space<vmem>>, vector<8x128xf32>,
    return
  }
  func.func @transform_0(%arg0: i32) -> (i32, i32) {
    %c0_i32 = arith.constant 0 : i32
    %c0_i32_0 = arith.constant 0 : i32
    return %arg0, %c0_i32 : i32, i32
  }
  func.func @transform_1(%arg0: i32) -> (i32, i32) {
    %c0_i32 = arith.constant 0 : i32
    %c0_i32_0 = arith.constant 0 : i32
    %c0_i32_1 = arith.constant 0 : i32
    return %c0_i32, %c0_i32_0 : i32, i32
  }
  func.func @transform_2(%arg0: i32) -> (i32, i32) {
    %c0_i32 = arith.constant 0 : i32
    %c0_i32_0 = arith.constant 0 : i32
    %c0_i32_1 = arith.constant 0 : i32
    return %c0_i32, %c0_i32_0 : i32, i32
  }
  func.func @transform_3(%arg0: i32) -> (i32, i32) {
    %c0_i32 = arith.constant 0 : i32
    %c0_i32_0 = arith.constant 0 : i32
    %c0_i32_1 = arith.constant 0 : i32
    return %c0_i32, %c0_i32_0 : i32, i32
  }
  func.func @transform_4(%arg0: i32) -> (i32, i32) {
    %c0_i32 = arith.constant 0 : i32
    %c0_i32_0 = arith.constant 0 : i32
    %c0_i32_1 = arith.constant 0 : i32
    return %c0_i32, %c0_i32_0 : i32, i32
  }
  func.func @transform_5(%arg0: i32) -> (i32, i32) {
    %c0_i32 = arith.constant 0 : i32
    %c0_i32_0 = arith.constant 0 : i32
    %c0_i32_1 = arith.constant 0 : i32
    return %c0_i32, %c0_i32_0 : i32, i32
  }
  func.func @transform_6(%arg0: i32) -> (i32, i32) {
    %c0_i32 = arith.constant 0 : i32
    %c0_i32_0 = arith.constant 0 : i32
    %c0_i32_1 = arith.constant 0 : i32
    return %c0_i32, %c0_i32_0 : i32, i32
  }
  func.func @transform_7(%arg0: i32) -> (i32, i32) {
    %c0_i32 = arith.constant 0 : i32
    %c0_i32_0 = arith.constant 0 : i32
    return %arg0, %c0_i32 : i32, i32
  }
}

</mosaic_0001>

<bundles_post_ra>
// kernel: tpu_custom_call.1
= control target key start
LH: loop header
LB: loop body
LE: loop exit
PB: predicated region body
PF: predicated region fallthrough
CT: control target
= control target key end

     0   :  { %v421_v3 = vmov 0.0|0.0   ;;  %vm422_vm0 = vmmov 0   ;;  %v423_v6 = vmov 0.0   ;;  %s542_s0 = inlined_call_operand.vmem [shape: f32[8,32], index: 0, kind: input, shape index: {}]   ;;  %s543_s1 = inlined_call_operand.vmem [shape: f32[32,64], index: 1, kind: input, shape index: {}]   ;;  %s544_s2 = inlined_call_operand.vmem [shape: f32[1,64], index: 2, kind: input, shape index: {}]   ;;  %s545_s3 = inlined_call_operand.vmem [shape: f32[64,32], index: 3, kind: input, shape index: {}]   ;;  %s546_s4 = inlined_call_operand.vmem [shape: f32[1,32], index: 4, kind: input, shape index: {}]   ;;  %s547_s5 = inlined_call_operand.vmem [shape: f32[32,128], index: 5, kind: input, shape index: {}]   ;;  %s548_s6 = inlined_call_operand.vmem [shape: f32[1,128], index: 6, kind: input, shape index: {}]   ;;  %s549_s7 = inlined_call_operand.hbm [shape: f32[8,128], index: 7, kind: output, shape index: {}]  }
   0x1   :  { %v28_v0 = vld [vmem:[%s543_s1] sm:$0xff]  ;;  %v29_v1 = vld [vmem:[%s543_s1 + $0x8] sm:$0xff]  ;;  %v30_v2 = vld [vmem:[%s543_s1 + $0x10] sm:$0xff]  ;;  %369 = vmatprep.subr.bf16.mxu0 %v421_v3  ;;  %336 = vmatprep.mubr.msk.f32.mxu0 %vm422_vm0, %v423_v6 }
   0x2   :  { %v370_v4 = vpack.c.bf16 %v29_v1, %v28_v0  ;;  %v31_v5 = vld [vmem:[%s543_s1 + $0x18] sm:$0xff]  ;;  %v114_v7 = vld [vmem:[%s545_s3] sm:$0xff]  ;;  %375 = vmatprep.subr.bf16.mxu1 %v421_v3  ;;  %v115_v8 = vld [vmem:[%s545_s3 + $0x8] sm:$0xff]  ;;  %355 = vmatprep.mubr.msk.f32.mxu1 %vm422_vm0, %v423_v6 }
   0x3   :  { %v116_v9 = vld [vmem:[%s545_s3 + $0x10] sm:$0xff]  ;;  %v117_v10 = vld [vmem:[%s545_s3 + $0x18] sm:$0xff]  ;;  %v373_v11 = vpack.c.bf16 %v31_v5, %v30_v2  ;;  %v376_v12 = vpack.c.bf16 %v115_v8, %v114_v7 }
   0x4   :  { %371 = vmatpush3.bf16.msra.mxu0 %v370_v4 }
   0x5   :  { %372 = vmatprep.subr.bf16.mxu0 %v421_v3 }
   0x6   :  { %12 = vsyncpa [#allocation3], 0  ;;  %377 = vmatpush3.bf16.msra.mxu1 %v376_v12  ;;  %v379_v13 = vpack.c.bf16 %v117_v10, %v116_v9  ;;  %v118_v14 = vld [vmem:[%s545_s3 + $0x20] sm:$0xff]  ;;  %v119_v15 = vld [vmem:[%s545_s3 + $0x28] sm:$0xff]  ;;  %vm39_vm1 = vcmask 261120   ;;  %vm129_vm2 = vcmask 523264  }
   0x7   :  { %378 = vmatprep.subr.bf16.mxu1 %v421_v3  ;;  %v27_v16 = vld [vmem:[%s542_s0] sm:$0xff]  ;;  %v382_v17 = vpack.c.bf16 %v119_v15, %v118_v14  ;;  %v120_v18 = vld [vmem:[%s545_s3 + $0x30] sm:$0xff]  ;;  %v121_v19 = vld [vmem:[%s545_s3 + $0x38] sm:$0xff]  ;;  %s424_s14 = smov [#allocation2]  }
   0x8   :  { %374 = vmatpush3.bf16.msra.mxu0 %v373_v11  ;;  %v385_v20 = vpack.c.bf16 %v121_v19, %v120_v18  ;;  %v204_v21 = vld [vmem:[%s547_s5] sm:$0xff]  ;;  %v205_v22 = vld [vmem:[%s547_s5 + $0x8] sm:$0xff]  ;;  %v206_v29 = vld [vmem:[%s547_s5 + $0x10] sm:$0xff]  ;;  %s295_s15 = sshll.u32 %s424_s14, 4  ;;  %s296_s15 = int_to_ptr.vmem [resolvable:$true] %s295_s15 }
   0x9   :  { %387 = vmatprep.subr.bf16.mxu0 %v421_v3  ;;  %v388_v23 = vpack.c.bf16 %v205_v22, %v204_v21  ;;  %v303_v24 = vld [vmem:[%s544_s2] ss:$0 sm:$0xff]  ;;  %v207_v30 = vld [vmem:[%s547_s5 + $0x18] sm:$0xff]  ;;  %s397_s5 = scalar_lea.vmem %s296_s15, 128  ;;  %p402_p1 = scmp.lt.s32.totalorder %s296_s15, %s296_s15 }
   0xa   :  { %380 = vmatpush3.bf16.msra.mxu1 %v379_v13  ;;  %v391_v31 = vpack.c.bf16 %v207_v30, %v206_v29  ;;  %v305_v32 = vld [vmem:[%s546_s4] ss:$0 sm:$0xff]  ;;  %p398_p0 = scmp.ne.s32.totalorder %s296_s15, %s397_s5  ;;  %p403_p2 = scmp.lt.s32.totalorder %s397_s5, %s397_s5 }
   0xb   :  { %337 = vmatmul.mubr.msk.f32.vlgmr.msra.gmra.mrb[0].mxu0 %vm39_vm1, %v27_v16  ;;  %381 = vmatprep.subr.bf16.mxu1 %v421_v3  ;;  %v307_v37 = vld [vmem:[%s548_s6] ss:$0 sm:$0xff] }
   0xc   :  { %366 = vmatprep.mubr.msk.f32.mxu0 %vm422_vm0, %v423_v6  ;;  %389 = vmatpush3.bf16.msra.mxu0 %v388_v23  ;;  %p404_p3 = por %p403_p2, %p402_p1 }
   0xd   :  { %390 = vmatprep.subr.bf16.mxu0 %v421_v3 }
   0xe   :  { %383 = vmatpush3.bf16.msra.mxu1 %v382_v17  ;;  %p405_p4 = pnand %p404_p3, %p398_p0 }
   0xf   :  { %384 = vmatprep.subr.bf16.mxu1 %v421_v3 }
  0x10   :  { %392 = vmatpush3.bf16.msra.mxu0 %v391_v31 }
  0x12   :  { %386 = vmatpush3.bf16.msra.mxu1 %v385_v20 }
  0xde   :  { %v109_v25 = vpop.f32.mrb[0].mxu0 }
  0xdf   :  { %v110_v26 = vadd.f32 %v303_v24, %v109_v25  ;;  %v338_v27 = vpop.f32.mrb[1].mxu0 }
  0xe1   :  { %v113_v28 = vmax.f32 %v110_v26, 0.0 }
  0xe3   :  { %356 = vmatmul.mubr.msk.f32.vlgmr.msra.gmra.mrb[0].mxu1 %vm129_vm2, %v113_v28 }
 0x1b6   :  { %v199_v33 = vpop.f32.mrb[0].mxu1 }
 0x1b7   :  { %v200_v34 = vadd.f32 %v305_v32, %v199_v33  ;;  %v357_v35 = vpop.f32.mrb[1].mxu1 }
 0x1b9   :  { %v203_v36 = vmax.f32 %v200_v34, 0.0 }
 0x1bb   :  { %367 = vmatmul.mubr.msk.f32.vlgmr.msra.gmra.mrb[2].mxu0 %vm39_vm1, %v203_v36 }
 0x28e   :  { %v284_v38 = vpop.f32.mrb[2].mxu0 }
 0x28f   :  { %v285_v39 = vadd.f32 %v307_v37, %v284_v38  ;;  %v368_v40 = vpop.f32.mrb[3].mxu0 }
 0x291   :  { %288 = vst [vmem:[#allocation2] sm:$0xff] %v285_v39 }
 0x292   :  { %408 = shalt.err (!%p405_p4)
}
 0x293   :  { %s409_s1 = scalar_lea.hbm %s549_s7, 128 }
 0x294   :  { %p410_p5 = scmp.ne.s32.totalorder %s549_s7, %s409_s1  ;;  %p413_p6 = scmp.lt.u32.totalorder %s409_s1, %s549_s7 }
 0x296   :  { %p415_p7 = pnand %p413_p6, %p410_p5 }
 0x298   :  { %418 = shalt.err (!%p415_p7)
}
 0x299   :  { %298 = dma.vmem_to_hbm [thread:$0]  %s296_s15, 128, %s549_s7, [#allocation3]  }
 0x29a   :  { %419 = dma.done.wait [#allocation3], 128  }
 0x29b   :  { %420 = vsyncadd [#allocation3], 4294967168 }
 0x29c   :  { %302 = vsyncpa [#allocation3], 1 }

</bundles_post_ra>
